<compile_context>
chip_gen: v7x
topology: tpu7x:2x2x1
jax: 0.10.0
libtpu: 0.0.40
codegen_flags: <defaults>
</compile_context>

<pallas_src>
import jax
import jax.numpy as jnp
from jax.experimental import pallas as pl
from jax.experimental.pallas import tpu as pltpu

IN_F, H1_F, H2_F = 784, 512, 256


def _disc_kernel(x_ref, w1_ref, w2_ref, w3_ref, o_ref):
    # x_ref : [TB, 784] f32     w1_ref: [784, 512] bf16
    # w2_ref: [512, 256] bf16   w3_ref: [1, 256]   f32
    # o_ref : [TB, 1] f32

    # fc1: cast x to bf16 in-kernel (VPU), bf16 MXU operands, f32 accumulate.
    h1 = jnp.dot(x_ref[...].astype(jnp.bfloat16), w1_ref[...],
                 preferred_element_type=jnp.float32)
    # leaky_relu(0.2) in bf16: halves VALU/ld-st work and h1 footprint; the
    # result feeds fc2's MXU operand (which wants bf16) directly.
    h1 = h1.astype(jnp.bfloat16)
    h1 = jnp.where(h1 > 0, h1, 0.2 * h1)

    # fc2: bf16 MXU operands, f32 accumulate; activation in f32 (VPU).
    h2 = jnp.dot(h1, w2_ref[...], preferred_element_type=jnp.float32)
    h2 = jnp.where(h2 > 0, h2, 0.2 * h2)

    # fc3 (out_features == 1): VPU multiply + row-reduce instead of a
    # 1-column MXU matmul (avoids wasting 255/256 MXU output columns).
    logits = jnp.sum(h2 * w3_ref[...], axis=-1, keepdims=True)
    o_ref[...] = jax.nn.sigmoid(logits).astype(o_ref.dtype)


def prepare_params(w1, w2, w3):
    """One-time conversion of PyTorch-layout weights ([out, in], float32).

    Call once at parameter creation / after each optimizer step, NOT inside
    the forward, so no transpose/convert traffic lands in the hot loop.
    """
    w1t = jnp.asarray(w1, jnp.float32).T.astype(jnp.bfloat16)   # [784, 512]
    w2t = jnp.asarray(w2, jnp.float32).T.astype(jnp.bfloat16)   # [512, 256]
    w3r = jnp.asarray(w3, jnp.float32).reshape(1, H2_F)         # [1, 256] f32
    return w1t, w2t, w3r


def _round_up(v, m):
    return ((v + m - 1) // m) * m


def _pick_tile(B):
    """Batch tile: >=2 grid steps when possible (v7x dual TC), capped at 1024
    to amortize per-step overhead; multiple of 16 so the block is legal for
    either f32 or bf16 inputs."""
    if B <= 16:
        return B                         # single block == full batch dim
    TB = min(1024, _round_up(pl.cdiv(B, 2), 16))
    TB = min(TB, (B // 16) * 16)         # multiple of 16, never exceeding B
    return max(TB, 16)


def disc_net_forward(x, w1t, w2t, w3r):
    """Pallas forward of DiscNet.

    x   : [B, 1, 28, 28] float32 (anything flattening to [-1, 784])
    w1t : [784, 512] bf16, w2t: [512, 256] bf16, w3r: [1, 256] f32
          (from prepare_params)
    returns: [B, 1] float32 in (0, 1)
    """
    x2d = x.reshape(-1, IN_F)
    B = x2d.shape[0]
    TB = _pick_tile(B)
    grid = (pl.cdiv(B, TB),)             # ragged last block: writes are masked

    flops = 2 * B * (IN_F * H1_F + H1_F * H2_F + H2_F)
    bytes_accessed = (B * IN_F * x2d.dtype.itemsize   # x streamed as-is
                      + IN_F * H1_F * 2               # w1 (bf16)
                      + H1_F * H2_F * 2               # w2 (bf16)
                      + H2_F * 4                      # w3 (f32)
                      + B * 4)                        # out (f32)

    vmem_limit = (32 << 20) if TB >= 512 else (16 << 20)

    out = pl.pallas_call(
        _disc_kernel,
        out_shape=jax.ShapeDtypeStruct((B, 1), jnp.float32),
        grid=grid,
        in_specs=[
            pl.BlockSpec((TB, IN_F), lambda i: (i, 0)),    # streamed x tile
            pl.BlockSpec((IN_F, H1_F), lambda i: (0, 0)),  # resident weights
            pl.BlockSpec((H1_F, H2_F), lambda i: (0, 0)),
            pl.BlockSpec((1, H2_F), lambda i: (0, 0)),
        ],
        out_specs=pl.BlockSpec((TB, 1), lambda i: (i, 0)),
        compiler_params=pltpu.CompilerParams(
            dimension_semantics=("parallel",),
            vmem_limit_bytes=vmem_limit,
        ),
        cost_estimate=pl.CostEstimate(
            flops=flops, transcendentals=B, bytes_accessed=bytes_accessed),
    )(x2d, w1t, w2t, w3r)
    return out


def _reference(x, w1, w2, w3):
    """Pure-JAX f32 reference matching the PyTorch module (bias=False)."""
    x2d = x.reshape(-1, IN_F).astype(jnp.float32)
    h1 = x2d @ w1.T
    h1 = jnp.where(h1 > 0, h1, 0.2 * h1)
    h2 = h1 @ w2.T
    h2 = jnp.where(h2 > 0, h2, 0.2 * h2)
    return jax.nn.sigmoid(h2 @ w3.T)


if __name__ == "__main__":
    key = jax.random.PRNGKey(0)
    k_x, k_w1, k_w2, k_w3 = jax.random.split(key, 4)

    # Small deterministic example: batch=8 MNIST-shaped images (NCHW).
    x = jax.random.normal(k_x, (8, 1, 28, 28), dtype=jnp.float32)

    # Deterministic parameter init (Kaiming-uniform-ish scale, like nn.Linear),
    # stored PyTorch-style as [out, in].
    def init_w(k, out_f, in_f):
        bound = float(in_f) ** -0.5
        return jax.random.uniform(k, (out_f, in_f), jnp.float32, -bound, bound)

    w1 = init_w(k_w1, H1_F, IN_F)   # [512, 784]
    w2 = init_w(k_w2, H2_F, H1_F)   # [256, 512]
    w3 = init_w(k_w3, 1, H2_F)      # [1, 256]

    params = prepare_params(w1, w2, w3)   # one-time layout/dtype conversion

    # Check 1: tiny batch (single grid step, full-dim block).
    y = disc_net_forward(x, *params)
    jax.block_until_ready(y)
    y_ref = _reference(x, w1, w2, w3)
    assert y.shape == (8, 1), y.shape
    assert jnp.allclose(y, y_ref, atol=2e-2, rtol=2e-2), (
        "mismatch vs reference (B=8): max abs err "
        f"{float(jnp.max(jnp.abs(y - y_ref)))}")

    # Check 2: ragged batch (grid of 2, last block partially masked).
    x2 = jax.random.normal(key, (40, IN_F), dtype=jnp.float32)
    y2 = disc_net_forward(x2, *params)
    jax.block_until_ready(y2)
    y2_ref = _reference(x2, w1, w2, w3)
    assert y2.shape == (40, 1), y2.shape
    assert jnp.allclose(y2, y2_ref, atol=2e-2, rtol=2e-2), (
        "mismatch vs reference (B=40): max abs err "
        f"{float(jnp.max(jnp.abs(y2 - y2_ref)))}")

    print("KERNEL_OK")
</pallas_src>

<mosaic_0001>
module attributes {stable_mosaic.version = 11 : i64} {
  func.func @_disc_kernel(%arg0: i32, %arg1: memref<8x784xf32, #tpu.memory_space<vmem>>, %arg2: memref<784x512xbf16, #tpu.memory_space<vmem>>, %arg3: memref<512x256xbf16, #tpu.memory_space<vmem>>, %arg4: memref<1x256xf32, #tpu.memory_space<vmem>>, %arg5: memref<8x1xf32, #tpu.memory_space<vmem>>) attributes {dimension_semantics = [#tpu.dimension_semantics<parallel>], iteration_bounds = array<i64: 1>, scalar_prefetch = 0 : i64, scratch_operands = 0 : i64, tpu.core_type = #tpu.core_type<tc>, window_params = [{transform_indices = @transform_0, window_bounds = array<i64: 8, 784>}, {pipeline_mode = #tpu.pipeline_mode<synchronous>, transform_indices = @transform_1, window_bounds = array<i64: 784, 512>}, {pipeline_mode = #tpu.pipeline_mode<synchronous>, transform_indices = @transform_2, window_bounds = array<i64: 512, 256>}, {pipeline_mode = #tpu.pipeline_mode<synchronous>, transform_indices = @transform_3, window_bounds = array<i64: 1, 256>}, {transform_indices = @transform_4, window_bounds = array<i64: 8, 1>}]} {
    %c0 = arith.constant 0 : index
    %c0_0 = arith.constant 0 : index
    %0 = vector.load %arg1[%c0, %c0_0] : memref<8x784xf32, #tpu.memory_space<vmem>>, vector<8x784xf32>
    %1 = arith.truncf %0 : vector<8x784xf32> to vector<8x784xbf16>
    %c0_1 = arith.constant 0 : index
    %c0_2 = arith.constant 0 : index
    %2 = vector.load %arg2[%c0_1, %c0_2] : memref<784x512xbf16, #tpu.memory_space<vmem>>, vector<784x512xbf16>
    %cst = arith.constant dense<0.000000e+00> : vector<8x512xf32>
    %3 = tpu.matmul %1, %2, %cst {dimension_numbers = #tpu.dot_dimension_numbers<[1], [0], [0], [1], [0, 0, 1, 1], [], []>} : vector<8x784xbf16>, vector<784x512xbf16>, vector<8x512xf32> -> vector<8x512xf32>
    %4 = arith.truncf %3 : vector<8x512xf32> to vector<8x512xbf16>
    %cst_3 = arith.constant 0.000000e+00 : bf16
    %5 = vector.broadcast %cst_3 : bf16 to vector<8x512xbf16>
    %6 = arith.cmpf ogt, %4, %5 : vector<8x512xbf16>
    %cst_4 = arith.constant 2.001950e-01 : bf16
    %7 = vector.broadcast %cst_4 : bf16 to vector<8x512xbf16>
    %8 = arith.mulf %7, %4 : vector<8x512xbf16>
    %9 = arith.select %6, %4, %8 : vector<8x512xi1>, vector<8x512xbf16>
    %c0_5 = arith.constant 0 : index
    %c0_6 = arith.constant 0 : index
    %10 = vector.load %arg3[%c0_5, %c0_6] : memref<512x256xbf16, #tpu.memory_space<vmem>>, vector<512x256xbf16>
    %cst_7 = arith.constant dense<0.000000e+00> : vector<8x256xf32>
    %11 = tpu.matmul %9, %10, %cst_7 {dimension_numbers = #tpu.dot_dimension_numbers<[1], [0], [0], [1], [0, 0, 1, 1], [], []>} : vector<8x512xbf16>, vector<512x256xbf16>, vector<8x256xf32> -> vector<8x256xf32>
    %cst_8 = arith.constant 0.000000e+00 : f32
    %12 = vector.broadcast %cst_8 : f32 to vector<8x256xf32>
    %13 = arith.cmpf ogt, %11, %12 : vector<8x256xf32>
    %cst_9 = arith.constant 2.000000e-01 : f32
    %14 = vector.broadcast %cst_9 : f32 to vector<8x256xf32>
    %15 = arith.mulf %14, %11 : vector<8x256xf32>
    %16 = arith.select %13, %11, %15 : vector<8x256xi1>, vector<8x256xf32>
    %c0_10 = arith.constant 0 : index
    %c0_11 = arith.constant 0 : index
    %17 = vector.load %arg4[%c0_10, %c0_11] : memref<1x256xf32, #tpu.memory_space<vmem>>, vector<1x256xf32>
    %18 = vector.broadcast %17 : vector<1x256xf32> to vector<8x256xf32>
    %19 = arith.mulf %16, %18 : vector<8x256xf32>
    %cst_12 = arith.constant dense<0.000000e+00> : vector<8xf32>
    %20 = vector.multi_reduction <add>, %19, %cst_12 [1] : vector<8x256xf32> to vector<8xf32>
    %21 = vector.shape_cast %20 : vector<8xf32> to vector<8x1xf32>
    %22 = arith.negf %21 : vector<8x1xf32>
    %23 = math.exp %22 : vector<8x1xf32>
    %cst_13 = arith.constant 1.000000e+00 : f32
    %24 = vector.broadcast %cst_13 : f32 to vector<8x1xf32>
    %25 = arith.addf %24, %23 : vector<8x1xf32>
    %26 = arith.divf %24, %25 : vector<8x1xf32>
    %c0_14 = arith.constant 0 : index
    %c0_15 = arith.constant 0 : index
    %27 = vector.load %arg5[%c0_14, %c0_15] : memref<8x1xf32, #tpu.memory_space<vmem>>, vector<8x1xf32>
    tpu.vector_store %arg5[%c0_14, %c0_15], %26 {strides = array<i32>} : memref<8x1xf32, #tpu.memory_space<vmem>>, vector<8x1xf32>,
    return
  }
  func.func @transform_0(%arg0: i32) -> (i32, i32) {
    %c0_i32 = arith.constant 0 : i32
    %c0_i32_0 = arith.constant 0 : i32
    return %arg0, %c0_i32 : i32, i32
  }
  func.func @transform_1(%arg0: i32) -> (i32, i32) {
    %c0_i32 = arith.constant 0 : i32
    %c0_i32_0 = arith.constant 0 : i32
    %c0_i32_1 = arith.constant 0 : i32
    return %c0_i32, %c0_i32_0 : i32, i32
  }
  func.func @transform_2(%arg0: i32) -> (i32, i32) {
    %c0_i32 = arith.constant 0 : i32
    %c0_i32_0 = arith.constant 0 : i32
    %c0_i32_1 = arith.constant 0 : i32
    return %c0_i32, %c0_i32_0 : i32, i32
  }
  func.func @transform_3(%arg0: i32) -> (i32, i32) {
    %c0_i32 = arith.constant 0 : i32
    %c0_i32_0 = arith.constant 0 : i32
    %c0_i32_1 = arith.constant 0 : i32
    return %c0_i32, %c0_i32_0 : i32, i32
  }
  func.func @transform_4(%arg0: i32) -> (i32, i32) {
    %c0_i32 = arith.constant 0 : i32
    %c0_i32_0 = arith.constant 0 : i32
    return %arg0, %c0_i32 : i32, i32
  }
}

</mosaic_0001>

<bundles_post_ra>
// kernel: tpu_custom_call.1
= control target key start
LH: loop header
LB: loop body
LE: loop exit
PB: predicated region body
PF: predicated region fallthrough
CT: control target
= control target key end

     0   :  { %9 = vsyncpa [#allocation3], 0  ;;  %s2967_s0 = inlined_call_operand.hbm [shape: f32[8,784], index: 0, kind: input, shape index: {}]   ;;  %s2968_s1 = inlined_call_operand.hbm [shape: bf16[784,512], index: 1, kind: input, shape index: {}]   ;;  %s2969_s2 = inlined_call_operand.hbm [shape: bf16[512,256], index: 2, kind: input, shape index: {}]   ;;  %s2970_s3 = inlined_call_operand.vmem [shape: f32[1,256], index: 3, kind: input, shape index: {}]   ;;  %s2971_s4 = inlined_call_operand.vmem [shape: f32[8,1], index: 4, kind: output, shape index: {}]  }
   0x1   :  { %10 = vsyncpa [#allocation5], 0  ;;  %s2860_s15 = smov [#allocation4]   ;;  %s2790_s19 = scalar_lea.hbm %s2968_s1, 25088 }
   0x2   :  { %s26_s16 = sshll.u32 %s2860_s15, 4  ;;  %p2791_p0 = scmp.ne.s32.totalorder %s2968_s1, %s2790_s19  ;;  %s27_s16 = int_to_ptr.vmem [resolvable:$true] %s26_s16 }
   0x3   :  { %p2794_p1 = scmp.lt.u32.totalorder %s2790_s19, %s2968_s1 }
   0x5   :  { %p2796_p2 = pnand %p2794_p1, %p2791_p0 }
   0x7   :  { %2799 = shalt.err (!%p2796_p2)
}
   0x8   :  { %s2800_s24 = scalar_lea.vmem %s27_s16, 25088  ;;  %p2805_p4 = scmp.lt.s32.totalorder %s27_s16, %s27_s16 }
   0x9   :  { %p2801_p3 = scmp.ne.s32.totalorder %s27_s16, %s2800_s24  ;;  %p2806_p5 = scmp.lt.s32.totalorder %s2800_s24, %s2800_s24 }
   0xb   :  { %p2807_p6 = por %p2806_p5, %p2805_p4 }
   0xd   :  { %p2808_p7 = pnand %p2807_p6, %p2801_p3 }
   0xf   :  { %2811 = shalt.err (!%p2808_p7)
}
  0x10   :  { %s2861_s25 = smov 256   ;;  %s2862_s26 = smov 16  }
  0x11   :  { %32 = dma.hbm_to_vmem [thread:$0]  %s2968_s1, 25088, %s27_s16, [#allocation5], %s2861_s25, %s2861_s25, %s2862_s26  }
  0x12   :  { %s2863_s29 = smov [#allocation2]   ;;  %s2864_s5 = smov [#allocation6]  }
  0x13   :  { %s17_s30 = sshll.u32 %s2863_s29, 4  ;;  %s38_s6 = sshll.u32 %s2864_s5, 4  ;;  %s18_s30 = int_to_ptr.vmem [resolvable:$true] %s17_s30  ;;  %s39_s6 = int_to_ptr.vmem [resolvable:$true] %s38_s6 }
  0x14   :  { %s2812_s9 = scalar_lea.hbm %s2967_s0, 896 }
  0x15   :  { %p2813_p8 = scmp.ne.s32.totalorder %s2967_s0, %s2812_s9  ;;  %p2816_p9 = scmp.lt.u32.totalorder %s2812_s9, %s2967_s0 }
  0x17   :  { %p2818_p10 = pnand %p2816_p9, %p2813_p8 }
  0x19   :  { %2821 = shalt.err (!%p2818_p10)
}
  0x1a   :  { %s2822_s1 = scalar_lea.vmem %s18_s30, 896  ;;  %p2827_p12 = scmp.lt.s32.totalorder %s18_s30, %s18_s30 }
  0x1b   :  { %p2823_p11 = scmp.ne.s32.totalorder %s18_s30, %s2822_s1  ;;  %p2828_p13 = scmp.lt.s32.totalorder %s2822_s1, %s2822_s1 }
  0x1d   :  { %p2829_p0 = por %p2828_p13, %p2827_p12 }
  0x1f   :  { %p2830_p1 = pnand %p2829_p0, %p2823_p11 }
  0x21   :  { %2833 = shalt.err (!%p2830_p1)
}
  0x22   :  { %20 = dma.hbm_to_vmem [thread:$0]  %s2967_s0, 896, %s18_s30, [#allocation3]  }
  0x23   :  { %s2834_s18 = scalar_lea.hbm %s2969_s2, 8192 }
  0x24   :  { %p2835_p2 = scmp.ne.s32.totalorder %s2969_s2, %s2834_s18  ;;  %p2838_p3 = scmp.lt.u32.totalorder %s2834_s18, %s2969_s2 }
  0x26   :  { %p2840_p4 = pnand %p2838_p3, %p2835_p2 }
  0x28   :  { %2843 = shalt.err (!%p2840_p4)
}
  0x29   :  { %s2844_s23 = scalar_lea.vmem %s39_s6, 8192  ;;  %p2849_p6 = scmp.lt.s32.totalorder %s39_s6, %s39_s6 }
  0x2a   :  { %p2845_p5 = scmp.ne.s32.totalorder %s39_s6, %s2844_s23  ;;  %p2850_p7 = scmp.lt.s32.totalorder %s2844_s23, %s2844_s23 }
  0x2c   :  { %p2851_p8 = por %p2850_p7, %p2849_p6 }
  0x2e   :  { %p2852_p9 = pnand %p2851_p8, %p2845_p5 }
  0x30   :  { %2855 = shalt.err (!%p2852_p9)
}
  0x31   :  { %s2865_s0 = smov 128   ;;  %s2866_s24 = smov 8  }
  0x32   :  { %44 = dma.hbm_to_vmem [thread:$0]  %s2969_s2, 8192, %s39_s6, [#allocation5], %s2865_s0, %s2865_s0, %s2866_s24  }
  0x33   :  { %2856 = dma.done.wait [#allocation3], 896  }
  0x34   :  { %2857 = vsyncadd [#allocation3], 4294966400 }
  0x35   :  { %2858 = dma.done.wait [#allocation5], 33280  }
  0x36   :  { %2859 = vsyncadd [#allocation5], 4294934016  ;;  %v2396_v0 = vld [vmem:[#allocation4 + $0x4] ss:$16 sps:$4 sm:$0xff]   ;;  %v2400_v2 = vld [vmem:[#allocation4] ss:$16 sps:$4 sm:$0xff]  }
  0x37   :  { %v2398_v1 = vld [vmem:[#allocation4 + $0x204] ss:$16 sps:$4 sm:$0xff]   ;;  %1252 = vmatprep.subr.bf16.mxu1 %v2396_v0  ;;  %v2401_v3 = vld [vmem:[#allocation4 + $0x200] ss:$16 sps:$4 sm:$0xff]   ;;  %vm1248_vm0 = vcmask 130048   ;;  %vm2091_vm7 = vcmask 7168  }
  0x38   :  { %1293 = vmatprep.subr.bf16.mxu0 %v2398_v1  ;;  %v2402_v4 = vld [vmem:[#allocation4 + $0x24] ss:$16 sps:$4 sm:$0xff]   ;;  %1253 = vmatpush1.bf16.msra.mxu1 %v2400_v2  ;;  %v2406_v6 = vld [vmem:[#allocation4 + $0x20] ss:$16 sps:$4 sm:$0xff]  }
  0x39   :  { %1294 = vmatpush1.bf16.msra.mxu0 %v2401_v3  ;;  %v2404_v5 = vld [vmem:[#allocation4 + $0x224] ss:$16 sps:$4 sm:$0xff]   ;;  %1254 = vmatprep.subr.bf16.mxu1 %v2402_v4  ;;  %v2407_v7 = vld [vmem:[#allocation4 + $0x220] ss:$16 sps:$4 sm:$0xff]   ;;  %v58_v4 = vld [vmem:[#allocation2] sm:$0xff] }
  0x3a   :  { %1295 = vmatprep.subr.bf16.mxu0 %v2404_v5  ;;  %v2408_v8 = vld [vmem:[#allocation4 + $0x44] ss:$16 sps:$4 sm:$0xff]   ;;  %v2412_v10 = vld [vmem:[#allocation4 + $0x40] ss:$16 sps:$4 sm:$0xff]  }
  0x3b   :  { %v2410_v9 = vld [vmem:[#allocation4 + $0x244] ss:$16 sps:$4 sm:$0xff]   ;;  %v2413_v11 = vld [vmem:[#allocation4 + $0x240] ss:$16 sps:$4 sm:$0xff]  }
  0x3c   :  { %1255 = vmatpush1.bf16.msra.mxu1 %v2406_v6  ;;  %v2414_v12 = vld [vmem:[#allocation4 + $0x64] ss:$16 sps:$4 sm:$0xff]   ;;  %v2418_v14 = vld [vmem:[#allocation4 + $0x60] ss:$16 sps:$4 sm:$0xff]   ;;  %v60_v6 = vld [vmem:[#allocation2 + $0x10] sm:$0xff] }
  0x3d   :  { %1296 = vmatpush1.bf16.msra.mxu0 %v2407_v7  ;;  %1256 = vmatprep.subr.bf16.mxu1 %v2408_v8  ;;  %v2416_v13 = vld [vmem:[#allocation4 + $0x264] ss:$16 sps:$4 sm:$0xff]   ;;  %v2419_v15 = vld [vmem:[#allocation4 + $0x260] ss:$16 sps:$4 sm:$0xff]   ;;  %v2497_v7 = vld [vmem:[#allocation4 + $0xc] ss:$16 sps:$4 sm:$0xff]   ;;  %v2935_v8 = vpack.c.bf16 %v58_v4, %v58_v4 }
  0x3e   :  { %1297 = vmatprep.subr.bf16.mxu0 %v2410_v9  ;;  %v2420_v16 = vld [vmem:[#allocation4 + $0x84] ss:$16 sps:$4 sm:$0xff]   ;;  %v2424_v18 = vld [vmem:[#allocation4 + $0x80] ss:$16 sps:$4 sm:$0xff]   ;;  %v2581_v4 = vld [vmem:[#allocation4 + $0x1cc] ss:$16 sps:$4 sm:$0xff]  }
  0x3f   :  { %v2422_v17 = vld [vmem:[#allocation4 + $0x284] ss:$16 sps:$4 sm:$0xff]   ;;  %v2425_v19 = vld [vmem:[#allocation4 + $0x280] ss:$16 sps:$4 sm:$0xff]  }
  0x40   :  { %1257 = vmatpush1.bf16.msra.mxu1 %v2412_v10  ;;  %v2426_v20 = vld [vmem:[#allocation4 + $0xa4] ss:$16 sps:$4 sm:$0xff]   ;;  %v2430_v22 = vld [vmem:[#allocation4 + $0xa0] ss:$16 sps:$4 sm:$0xff]   ;;  %v2495_v10 = vld [vmem:[#allocation4 + $0x8] ss:$16 sps:$4 sm:$0xff]  }
  0x41   :  { %1298 = vmatpush1.bf16.msra.mxu0 %v2413_v11  ;;  %1258 = vmatprep.subr.bf16.mxu1 %v2414_v12  ;;  %v2428_v21 = vld [vmem:[#allocation4 + $0x2a4] ss:$16 sps:$4 sm:$0xff]   ;;  %v2431_v23 = vld [vmem:[#allocation4 + $0x2a0] ss:$16 sps:$4 sm:$0xff]   ;;  %v2937_v11 = vpack.c.bf16 %v60_v6, %v60_v6  ;;  %v2579_v6 = vld [vmem:[#allocation4 + $0x1c8] ss:$16 sps:$4 sm:$0xff]  }
  0x42   :  { %1299 = vmatprep.subr.bf16.mxu0 %v2416_v13  ;;  %v2432_v24 = vld [vmem:[#allocation4 + $0xc4] ss:$16 sps:$4 sm:$0xff]   ;;  %v2436_v26 = vld [vmem:[#allocation4 + $0xc0] ss:$16 sps:$4 sm:$0xff]   ;;  %v2503_v13 = vld [vmem:[#allocation4 + $0x2c] ss:$16 sps:$4 sm:$0xff]  }
  0x43   :  { %v2434_v25 = vld [vmem:[#allocation4 + $0x2c4] ss:$16 sps:$4 sm:$0xff]   ;;  %v2437_v27 = vld [vmem:[#allocation4 + $0x2c0] ss:$16 sps:$4 sm:$0xff]  }
  0x44   :  { %1259 = vmatpush1.bf16.msra.mxu1 %v2418_v14  ;;  %v2438_v28 = vld [vmem:[#allocation4 + $0xe4] ss:$16 sps:$4 sm:$0xff]   ;;  %v2442_v30 = vld [vmem:[#allocation4 + $0xe0] ss:$16 sps:$4 sm:$0xff]  }
  0x45   :  { %1300 = vmatpush1.bf16.msra.mxu0 %v2419_v15  ;;  %1260 = vmatprep.subr.bf16.mxu1 %v2420_v16  ;;  %v2440_v29 = vld [vmem:[#allocation4 + $0x2e4] ss:$16 sps:$4 sm:$0xff]   ;;  %v2443_v31 = vld [vmem:[#allocation4 + $0x2e0] ss:$16 sps:$4 sm:$0xff]   ;;  %v2501_v15 = vld [vmem:[#allocation4 + $0x28] ss:$16 sps:$4 sm:$0xff]  }
  0x46   :  { %1301 = vmatprep.subr.bf16.mxu0 %v2422_v17  ;;  %v2444_v32 = vld [vmem:[#allocation4 + $0x104] ss:$16 sps:$4 sm:$0xff]   ;;  %v2448_v34 = vld [vmem:[#allocation4 + $0x100] ss:$16 sps:$4 sm:$0xff]   ;;  %v2509_v17 = vld [vmem:[#allocation4 + $0x4c] ss:$16 sps:$4 sm:$0xff]  }
  0x47   :  { %v2446_v33 = vld [vmem:[#allocation4 + $0x304] ss:$16 sps:$4 sm:$0xff]   ;;  %v2449_v35 = vld [vmem:[#allocation4 + $0x300] ss:$16 sps:$4 sm:$0xff]  }
  0x48   :  { %1261 = vmatpush1.bf16.msra.mxu1 %v2424_v18  ;;  %v2450_v36 = vld [vmem:[#allocation4 + $0x124] ss:$16 sps:$4 sm:$0xff]   ;;  %v2454_v38 = vld [vmem:[#allocation4 + $0x120] ss:$16 sps:$4 sm:$0xff]  }
  0x49   :  { %1302 = vmatpush1.bf16.msra.mxu0 %v2425_v19  ;;  %1262 = vmatprep.subr.bf16.mxu1 %v2426_v20  ;;  %v2452_v37 = vld [vmem:[#allocation4 + $0x324] ss:$16 sps:$4 sm:$0xff]   ;;  %v2455_v39 = vld [vmem:[#allocation4 + $0x320] ss:$16 sps:$4 sm:$0xff]   ;;  %v2507_v19 = vld [vmem:[#allocation4 + $0x48] ss:$16 sps:$4 sm:$0xff]  }
  0x4a   :  { %1303 = vmatprep.subr.bf16.mxu0 %v2428_v21  ;;  %v2456_v40 = vld [vmem:[#allocation4 + $0x144] ss:$16 sps:$4 sm:$0xff]   ;;  %v2460_v42 = vld [vmem:[#allocation4 + $0x140] ss:$16 sps:$4 sm:$0xff]   ;;  %v2515_v21 = vld [vmem:[#allocation4 + $0x6c] ss:$16 sps:$4 sm:$0xff]  }
  0x4b   :  { %v2458_v41 = vld [vmem:[#allocation4 + $0x344] ss:$16 sps:$4 sm:$0xff]   ;;  %v2461_v43 = vld [vmem:[#allocation4 + $0x340] ss:$16 sps:$4 sm:$0xff]  }
  0x4c   :  { %1263 = vmatpush1.bf16.msra.mxu1 %v2430_v22  ;;  %v2462_v44 = vld [vmem:[#allocation4 + $0x164] ss:$16 sps:$4 sm:$0xff]   ;;  %v2466_v47 = vld [vmem:[#allocation4 + $0x160] ss:$16 sps:$4 sm:$0xff]  }
  0x4d   :  { %1304 = vmatpush1.bf16.msra.mxu0 %v2431_v23  ;;  %1264 = vmatprep.subr.bf16.mxu1 %v2432_v24  ;;  %v2464_v45 = vld [vmem:[#allocation4 + $0x364] ss:$16 sps:$4 sm:$0xff]   ;;  %v2467_v50 = vld [vmem:[#allocation4 + $0x360] ss:$16 sps:$4 sm:$0xff]   ;;  %v2513_v23 = vld [vmem:[#allocation4 + $0x68] ss:$16 sps:$4 sm:$0xff]  }
  0x4e   :  { %1305 = vmatprep.subr.bf16.mxu0 %v2434_v25  ;;  %v59_v46 = vld [vmem:[#allocation2 + $0x8] sm:$0xff]  ;;  %v61_v49 = vld [vmem:[#allocation2 + $0x18] sm:$0xff]  ;;  %v2521_v25 = vld [vmem:[#allocation4 + $0x8c] ss:$16 sps:$4 sm:$0xff]  }
  0x4f   :  { %v2929_v48 = vpack.c.bf16 %v59_v46, %v59_v46  ;;  %v2468_v51 = vld [vmem:[#allocation4 + $0x184] ss:$16 sps:$4 sm:$0xff]   ;;  %v2931_v52 = vpack.c.bf16 %v61_v49, %v61_v49  ;;  %v2472_v54 = vld [vmem:[#allocation4 + $0x180] ss:$16 sps:$4 sm:$0xff]   ;;  %v2549_v49 = vld [vmem:[#allocation4 + $0x128] ss:$16 sps:$4 sm:$0xff]  }
  0x50   :  { %1265 = vmatpush1.bf16.msra.mxu1 %v2436_v26  ;;  %v2470_v53 = vld [vmem:[#allocation4 + $0x384] ss:$16 sps:$4 sm:$0xff]   ;;  %v2473_v55 = vld [vmem:[#allocation4 + $0x380] ss:$16 sps:$4 sm:$0xff]  }
  0x51   :  { %1306 = vmatpush1.bf16.msra.mxu0 %v2437_v27  ;;  %1266 = vmatprep.subr.bf16.mxu1 %v2438_v28  ;;  %v2474_v56 = vld [vmem:[#allocation4 + $0x1a4] ss:$16 sps:$4 sm:$0xff]   ;;  %v2478_v58 = vld [vmem:[#allocation4 + $0x1a0] ss:$16 sps:$4 sm:$0xff]   ;;  %v2519_v27 = vld [vmem:[#allocation4 + $0x88] ss:$16 sps:$4 sm:$0xff]  }
  0x52   :  { %1307 = vmatprep.subr.bf16.mxu0 %v2440_v29  ;;  %1284 = vmatprep.mubr.bf16.mxu1 %v2929_v48  ;;  %v2476_v57 = vld [vmem:[#allocation4 + $0x3a4] ss:$16 sps:$4 sm:$0xff]   ;;  %v2479_v59 = vld [vmem:[#allocation4 + $0x3a0] ss:$16 sps:$4 sm:$0xff]   ;;  %v2527_v29 = vld [vmem:[#allocation4 + $0xac] ss:$16 sps:$4 sm:$0xff]  }
  0x53   :  { %1325 = vmatprep.mubr.bf16.mxu0 %v2931_v52  ;;  %v2480_v60 = vld [vmem:[#allocation4 + $0x1c4] ss:$16 sps:$4 sm:$0xff]   ;;  %v2484_v62 = vld [vmem:[#allocation4 + $0x1c0] ss:$16 sps:$4 sm:$0xff]  }
  0x54   :  { %1267 = vmatpush1.bf16.msra.mxu1 %v2442_v30  ;;  %v2482_v61 = vld [vmem:[#allocation4 + $0x3c4] ss:$16 sps:$4 sm:$0xff]   ;;  %v2485_v63 = vld [vmem:[#allocation4 + $0x3c0] ss:$16 sps:$4 sm:$0xff]  }
  0x55   :  { %1308 = vmatpush1.bf16.msra.mxu0 %v2443_v31  ;;  %1268 = vmatprep.subr.bf16.mxu1 %v2444_v32  ;;  %v2486_v0 = vld [vmem:[#allocation4 + $0x1e4] ss:$16 sps:$4 sm:$0xff]   ;;  %v2490_v2 = vld [vmem:[#allocation4 + $0x1e0] ss:$16 sps:$4 sm:$0xff]   ;;  %v2525_v31 = vld [vmem:[#allocation4 + $0xa8] ss:$16 sps:$4 sm:$0xff]  }
  0x56   :  { %1309 = vmatprep.subr.bf16.mxu0 %v2446_v33  ;;  %v2488_v1 = vld [vmem:[#allocation4 + $0x3e4] ss:$16 sps:$4 sm:$0xff]   ;;  %v2491_v3 = vld [vmem:[#allocation4 + $0x3e0] ss:$16 sps:$4 sm:$0xff]   ;;  %v2533_v33 = vld [vmem:[#allocation4 + $0xcc] ss:$16 sps:$4 sm:$0xff]  }
  0x57   :  { %v2494_v5 = vld [vmem:[#allocation4 + $0x404] ss:$16 sps:$4 sm:$0xff]   ;;  %v2492_v9 = vld [vmem:[#allocation4 + $0x400] ss:$16 sps:$4 sm:$0xff]  }
  0x58   :  { %1269 = vmatpush1.bf16.msra.mxu1 %v2448_v34  ;;  %v2500_v12 = vld [vmem:[#allocation4 + $0x424] ss:$16 sps:$4 sm:$0xff]   ;;  %v2498_v14 = vld [vmem:[#allocation4 + $0x420] ss:$16 sps:$4 sm:$0xff]  }
  0x59   :  { %1310 = vmatpush1.bf16.msra.mxu0 %v2449_v35  ;;  %1270 = vmatprep.subr.bf16.mxu1 %v2450_v36  ;;  %v2506_v16 = vld [vmem:[#allocation4 + $0x444] ss:$16 sps:$4 sm:$0xff]   ;;  %v2504_v18 = vld [vmem:[#allocation4 + $0x440] ss:$16 sps:$4 sm:$0xff]  }
  0x5a   :  { %1311 = vmatprep.subr.bf16.mxu0 %v2452_v37  ;;  %v2512_v20 = vld [vmem:[#allocation4 + $0x464] ss:$16 sps:$4 sm:$0xff]   ;;  %v2510_v22 = vld [vmem:[#allocation4 + $0x460] ss:$16 sps:$4 sm:$0xff]   ;;  %v2531_v37 = vld [vmem:[#allocation4 + $0xc8] ss:$16 sps:$4 sm:$0xff]  }
  0x5b   :  { %v2518_v24 = vld [vmem:[#allocation4 + $0x484] ss:$16 sps:$4 sm:$0xff]   ;;  %v2516_v26 = vld [vmem:[#allocation4 + $0x480] ss:$16 sps:$4 sm:$0xff]  }
  0x5c   :  { %1271 = vmatpush1.bf16.msra.mxu1 %v2454_v38  ;;  %v2524_v28 = vld [vmem:[#allocation4 + $0x4a4] ss:$16 sps:$4 sm:$0xff]   ;;  %v2522_v30 = vld [vmem:[#allocation4 + $0x4a0] ss:$16 sps:$4 sm:$0xff]  }
  0x5d   :  { %1312 = vmatpush1.bf16.msra.mxu0 %v2455_v39  ;;  %1272 = vmatprep.subr.bf16.mxu1 %v2456_v40  ;;  %v2530_v32 = vld [vmem:[#allocation4 + $0x4c4] ss:$16 sps:$4 sm:$0xff]   ;;  %v2528_v36 = vld [vmem:[#allocation4 + $0x4c0] ss:$16 sps:$4 sm:$0xff]   ;;  %v2539_v39 = vld [vmem:[#allocation4 + $0xec] ss:$16 sps:$4 sm:$0xff]  }
  0x5e   :  { %1313 = vmatprep.subr.bf16.mxu0 %v2458_v41  ;;  %v63_v34 = vld [vmem:[#allocation2 + $0x28] sm:$0xff]  ;;  %v2537_v41 = vld [vmem:[#allocation4 + $0xe8] ss:$16 sps:$4 sm:$0xff]  }
  0x5f   :  { %v2942_v35 = vpack.c.bf16 %v63_v34, %v63_v34  ;;  %v2536_v38 = vld [vmem:[#allocation4 + $0x4e4] ss:$16 sps:$4 sm:$0xff]   ;;  %v2534_v40 = vld [vmem:[#allocation4 + $0x4e0] ss:$16 sps:$4 sm:$0xff]  }
  0x60   :  { %1273 = vmatpush1.bf16.msra.mxu1 %v2460_v42  ;;  %v2542_v42 = vld [vmem:[#allocation4 + $0x504] ss:$16 sps:$4 sm:$0xff]  }
  0x61   :  { %1314 = vmatpush1.bf16.msra.mxu0 %v2461_v43  ;;  %1274 = vmatprep.subr.bf16.mxu1 %v2462_v44  ;;  %v2545_v43 = vld [vmem:[#allocation4 + $0x10c] ss:$16 sps:$4 sm:$0xff]   ;;  %v2540_v44 = vld [vmem:[#allocation4 + $0x500] ss:$16 sps:$4 sm:$0xff]   ;;  %v2548_v46 = vld [vmem:[#allocation4 + $0x524] ss:$16 sps:$4 sm:$0xff]  }
  0x62   :  { %1315 = vmatprep.subr.bf16.mxu0 %v2464_v45  ;;  %v2543_v45 = vld [vmem:[#allocation4 + $0x108] ss:$16 sps:$4 sm:$0xff]   ;;  %v2692_v34 = vld [vmem:[#allocation6 + $0x4] ss:$8 sps:$4 sm:$0xff]  }
  0x64   :  { %1275 = vmatpush1.bf16.msra.mxu1 %v2466_v47  ;;  %v2551_v47 = vld [vmem:[#allocation4 + $0x12c] ss:$16 sps:$4 sm:$0xff]  }
  0x65   :  { %1316 = vmatpush1.bf16.msra.mxu0 %v2467_v50  ;;  %1276 = vmatprep.subr.bf16.mxu1 %v2468_v51  ;;  %v2554_v50 = vld [vmem:[#allocation4 + $0x544] ss:$16 sps:$4 sm:$0xff]   ;;  %v2557_v51 = vld [vmem:[#allocation4 + $0x14c] ss:$16 sps:$4 sm:$0xff]  }
  0x66   :  { %1317 = vmatprep.subr.bf16.mxu0 %v2470_v53  ;;  %v2552_v53 = vld [vmem:[#allocation4 + $0x540] ss:$16 sps:$4 sm:$0xff]  }
  0x68   :  { %1277 = vmatpush1.bf16.msra.mxu1 %v2472_v54  ;;  %v2555_v54 = vld [vmem:[#allocation4 + $0x148] ss:$16 sps:$4 sm:$0xff]  }
  0x69   :  { %1318 = vmatpush1.bf16.msra.mxu0 %v2473_v55  ;;  %1278 = vmatprep.subr.bf16.mxu1 %v2474_v56  ;;  %v2560_v55 = vld [vmem:[#allocation4 + $0x564] ss:$16 sps:$4 sm:$0xff]   ;;  %v2563_v56 = vld [vmem:[#allocation4 + $0x16c] ss:$16 sps:$4 sm:$0xff]  }
  0x6a   :  { %1319 = vmatprep.subr.bf16.mxu0 %v2476_v57  ;;  %v2558_v57 = vld [vmem:[#allocation4 + $0x560] ss:$16 sps:$4 sm:$0xff]  }
  0x6c   :  { %1279 = vmatpush1.bf16.msra.mxu1 %v2478_v58  ;;  %v2561_v58 = vld [vmem:[#allocation4 + $0x168] ss:$16 sps:$4 sm:$0xff]  }
  0x6d   :  { %1320 = vmatpush1.bf16.msra.mxu0 %v2479_v59  ;;  %1280 = vmatprep.subr.bf16.mxu1 %v2480_v60  ;;  %v2566_v59 = vld [vmem:[#allocation4 + $0x584] ss:$16 sps:$4 sm:$0xff]   ;;  %v2569_v60 = vld [vmem:[#allocation4 + $0x18c] ss:$16 sps:$4 sm:$0xff]  }
  0x6e   :  { %1321 = vmatprep.subr.bf16.mxu0 %v2482_v61  ;;  %v2564_v61 = vld [vmem:[#allocation4 + $0x580] ss:$16 sps:$4 sm:$0xff]  }
  0x70   :  { %1281 = vmatpush1.bf16.msra.mxu1 %v2484_v62  ;;  %v2567_v62 = vld [vmem:[#allocation4 + $0x188] ss:$16 sps:$4 sm:$0xff]  }
  0x71   :  { %1322 = vmatpush1.bf16.msra.mxu0 %v2485_v63  ;;  %1282 = vmatprep.subr.bf16.mxu1 %v2486_v0  ;;  %v2572_v63 = vld [vmem:[#allocation4 + $0x5a4] ss:$16 sps:$4 sm:$0xff]   ;;  %v2575_v0 = vld [vmem:[#allocation4 + $0x1ac] ss:$16 sps:$4 sm:$0xff]  }
  0x72   :  { %1323 = vmatprep.subr.bf16.mxu0 %v2488_v1  ;;  %v2570_v1 = vld [vmem:[#allocation4 + $0x5a0] ss:$16 sps:$4 sm:$0xff]  }
  0x74   :  { %1283 = vmatpush1.bf16.msra.mxu1 %v2490_v2  ;;  %v2573_v2 = vld [vmem:[#allocation4 + $0x1a8] ss:$16 sps:$4 sm:$0xff]  }
  0x75   :  { %1324 = vmatpush1.bf16.msra.mxu0 %v2491_v3  ;;  %1416 = vmatprep.subr.bf16.mxu1 %v2497_v7  ;;  %v2578_v3 = vld [vmem:[#allocation4 + $0x5c4] ss:$16 sps:$4 sm:$0xff]  }
  0x76   :  { %1334 = vmatprep.subr.bf16.mxu0 %v2494_v5  ;;  %v2576_v5 = vld [vmem:[#allocation4 + $0x5c0] ss:$16 sps:$4 sm:$0xff]   ;;  %v2584_v7 = vld [vmem:[#allocation4 + $0x5e4] ss:$16 sps:$4 sm:$0xff]  }
  0x77   :  { %1285 = vmatmul.mubr.bf16.vlgmr.msra.gmra.mrb[0].mxu1 %v2935_v8 }
  0x78   :  { %1326 = vmatmul.mubr.bf16.vlgmr.msra.gmra.mrb[0].mxu0 %v2937_v11  ;;  %1417 = vmatpush1.bf16.msra.mxu1 %v2495_v10  ;;  %v2582_v10 = vld [vmem:[#allocation4 + $0x5e0] ss:$16 sps:$4 sm:$0xff]  }
  0x79   :  { %1335 = vmatpush1.bf16.msra.mxu0 %v2492_v9  ;;  %1418 = vmatprep.subr.bf16.mxu1 %v2503_v13  ;;  %v2587_v9 = vld [vmem:[#allocation4 + $0x1ec] ss:$16 sps:$4 sm:$0xff]  }
  0x7a   :  { %1336 = vmatprep.subr.bf16.mxu0 %v2500_v12  ;;  %1448 = vmatprep.mubr.bf16.mxu1 %v2929_v48  ;;  %v2546_v48 = vld [vmem:[#allocation4 + $0x520] ss:$16 sps:$4 sm:$0xff]   ;;  %v2585_v12 = vld [vmem:[#allocation4 + $0x1e8] ss:$16 sps:$4 sm:$0xff]  }
  0x7b   :  { %1366 = vmatprep.mubr.bf16.mxu0 %v2942_v35  ;;  %v62_v13 = vld [vmem:[#allocation2 + $0x20] sm:$0xff] }
  0x7c   :  { %1419 = vmatpush1.bf16.msra.mxu1 %v2501_v15  ;;  %v2596_v15 = vld [vmem:[#allocation4 + $0x604] ss:$16 sps:$4 sm:$0xff]  }
  0x7d   :  { %1337 = vmatpush1.bf16.msra.mxu0 %v2498_v14  ;;  %1420 = vmatprep.subr.bf16.mxu1 %v2509_v17  ;;  %v2590_v14 = vld [vmem:[#allocation4 + $0x20c] ss:$16 sps:$4 sm:$0xff]   ;;  %v2588_v17 = vld [vmem:[#allocation4 + $0x208] ss:$16 sps:$4 sm:$0xff]  }
  0x7e   :  { %1338 = vmatprep.subr.bf16.mxu0 %v2506_v16  ;;  %v2945_v16 = vpack.c.bf16 %v62_v13, %v62_v13  ;;  %v2644_v13 = vld [vmem:[#allocation4 + $0x42c] ss:$16 sps:$4 sm:$0xff]  }
  0x80   :  { %1421 = vmatpush1.bf16.msra.mxu1 %v2507_v19  ;;  %v2593_v19 = vld [vmem:[#allocation4 + $0x22c] ss:$16 sps:$4 sm:$0xff]  }
  0x81   :  { %1339 = vmatpush1.bf16.msra.mxu0 %v2504_v18  ;;  %1422 = vmatprep.subr.bf16.mxu1 %v2515_v21  ;;  %v2594_v18 = vld [vmem:[#allocation4 + $0x600] ss:$16 sps:$4 sm:$0xff]   ;;  %v2599_v21 = vld [vmem:[#allocation4 + $0x24c] ss:$16 sps:$4 sm:$0xff]  }
  0x82   :  { %1340 = vmatprep.subr.bf16.mxu0 %v2512_v20  ;;  %v2591_v20 = vld [vmem:[#allocation4 + $0x228] ss:$16 sps:$4 sm:$0xff]  }
  0x84   :  { %1423 = vmatpush1.bf16.msra.mxu1 %v2513_v23  ;;  %v2597_v23 = vld [vmem:[#allocation4 + $0x248] ss:$16 sps:$4 sm:$0xff]  }
  0x85   :  { %1341 = vmatpush1.bf16.msra.mxu0 %v2510_v22  ;;  %1424 = vmatprep.subr.bf16.mxu1 %v2521_v25  ;;  %v2867_v22 = vmov 0   ;;  %v2602_v25 = vld [vmem:[#allocation4 + $0x26c] ss:$16 sps:$4 sm:$0xff]  }
  0x86   :  { %1342 = vmatprep.subr.bf16.mxu0 %v2518_v24  ;;  %v64_v24 = vld [vmem:[#allocation2 + $0x30] sm:$0xff] }
  0x88   :  { %1425 = vmatpush1.bf16.msra.mxu1 %v2519_v27  ;;  %v2951_v27 = vpack.c.bf16 %v64_v24, %v64_v24  ;;  %v2726_v24 = vld [vmem:[#allocation6 + $0xc0] ss:$8 sps:$4 sm:$0xff]  }
  0x89   :  { %1343 = vmatpush1.bf16.msra.mxu0 %v2516_v26  ;;  %1426 = vmatprep.subr.bf16.mxu1 %v2527_v29  ;;  %v2600_v26 = vld [vmem:[#allocation4 + $0x268] ss:$16 sps:$4 sm:$0xff]   ;;  %v2608_v29 = vld [vmem:[#allocation4 + $0x2ac] ss:$16 sps:$4 sm:$0xff]  }
  0x8a   :  { %1344 = vmatprep.subr.bf16.mxu0 %v2524_v28  ;;  %v2605_v28 = vld [vmem:[#allocation4 + $0x28c] ss:$16 sps:$4 sm:$0xff]  }
  0x8c   :  { %1427 = vmatpush1.bf16.msra.mxu1 %v2525_v31  ;;  %v2611_v31 = vld [vmem:[#allocation4 + $0x2cc] ss:$16 sps:$4 sm:$0xff]  }
  0x8d   :  { %1345 = vmatpush1.bf16.msra.mxu0 %v2522_v30  ;;  %1428 = vmatprep.subr.bf16.mxu1 %v2533_v33  ;;  %v2606_v30 = vld [vmem:[#allocation4 + $0x2a8] ss:$16 sps:$4 sm:$0xff]  }
  0x8e   :  { %1346 = vmatprep.subr.bf16.mxu0 %v2530_v32  ;;  %v2614_v32 = vld [vmem:[#allocation4 + $0x2ec] ss:$16 sps:$4 sm:$0xff]   ;;  %v2690_v33 = vld [vmem:[#allocation6] ss:$8 sps:$4 sm:$0xff]  }
  0x90   :  { %1429 = vmatpush1.bf16.msra.mxu1 %v2531_v37  ;;  %v2612_v37 = vld [vmem:[#allocation4 + $0x2e8] ss:$16 sps:$4 sm:$0xff]  }
  0x91   :  { %1347 = vmatpush1.bf16.msra.mxu0 %v2528_v36  ;;  %1430 = vmatprep.subr.bf16.mxu1 %v2539_v39  ;;  %v2695_v36 = vld [vmem:[#allocation6 + $0x14] ss:$8 sps:$4 sm:$0xff]  }
  0x92   :  { %1348 = vmatprep.subr.bf16.mxu0 %v2536_v38  ;;  %v2693_v38 = vld [vmem:[#allocation6 + $0x10] ss:$8 sps:$4 sm:$0xff]   ;;  %v2617_v39 = vld [vmem:[#allocation4 + $0x30c] ss:$16 sps:$4 sm:$0xff]  }
  0x94   :  { %1431 = vmatpush1.bf16.msra.mxu1 %v2537_v41  ;;  %v2615_v41 = vld [vmem:[#allocation4 + $0x308] ss:$16 sps:$4 sm:$0xff]  }
  0x95   :  { %1349 = vmatpush1.bf16.msra.mxu0 %v2534_v40  ;;  %1432 = vmatprep.subr.bf16.mxu1 %v2545_v43  ;;  %v2698_v40 = vld [vmem:[#allocation6 + $0x24] ss:$8 sps:$4 sm:$0xff]  }
  0x96   :  { %1350 = vmatprep.subr.bf16.mxu0 %v2542_v42  ;;  %v2696_v42 = vld [vmem:[#allocation6 + $0x20] ss:$8 sps:$4 sm:$0xff]   ;;  %v2620_v43 = vld [vmem:[#allocation4 + $0x32c] ss:$16 sps:$4 sm:$0xff]  }
  0x98   :  { %1433 = vmatpush1.bf16.msra.mxu1 %v2543_v45  ;;  %v2618_v45 = vld [vmem:[#allocation4 + $0x328] ss:$16 sps:$4 sm:$0xff]  }
  0x99   :  { %1351 = vmatpush1.bf16.msra.mxu0 %v2540_v44  ;;  %1434 = vmatprep.subr.bf16.mxu1 %v2551_v47  ;;  %v2701_v44 = vld [vmem:[#allocation6 + $0x34] ss:$8 sps:$4 sm:$0xff]  }
  0x9a   :  { %1352 = vmatprep.subr.bf16.mxu0 %v2548_v46  ;;  %v2699_v46 = vld [vmem:[#allocation6 + $0x30] ss:$8 sps:$4 sm:$0xff]   ;;  %v2623_v47 = vld [vmem:[#allocation4 + $0x34c] ss:$16 sps:$4 sm:$0xff]  }
  0x9c   :  { %1435 = vmatpush1.bf16.msra.mxu1 %v2549_v49  ;;  %v2621_v49 = vld [vmem:[#allocation4 + $0x348] ss:$16 sps:$4 sm:$0xff]  }
  0x9d   :  { %1353 = vmatpush1.bf16.msra.mxu0 %v2546_v48  ;;  %1436 = vmatprep.subr.bf16.mxu1 %v2557_v51  ;;  %v2704_v48 = vld [vmem:[#allocation6 + $0x44] ss:$8 sps:$4 sm:$0xff]  }
  0x9e   :  { %1354 = vmatprep.subr.bf16.mxu0 %v2554_v50  ;;  %v2702_v50 = vld [vmem:[#allocation6 + $0x40] ss:$8 sps:$4 sm:$0xff]   ;;  %v2626_v51 = vld [vmem:[#allocation4 + $0x36c] ss:$16 sps:$4 sm:$0xff]  }
  0xa0   :  { %1437 = vmatpush1.bf16.msra.mxu1 %v2555_v54  ;;  %v2624_v54 = vld [vmem:[#allocation4 + $0x368] ss:$16 sps:$4 sm:$0xff]  }
  0xa1   :  { %1355 = vmatpush1.bf16.msra.mxu0 %v2552_v53  ;;  %1438 = vmatprep.subr.bf16.mxu1 %v2563_v56  ;;  %v2707_v53 = vld [vmem:[#allocation6 + $0x54] ss:$8 sps:$4 sm:$0xff]  }
  0xa2   :  { %1356 = vmatprep.subr.bf16.mxu0 %v2560_v55  ;;  %v2705_v55 = vld [vmem:[#allocation6 + $0x50] ss:$8 sps:$4 sm:$0xff]   ;;  %v2629_v56 = vld [vmem:[#allocation4 + $0x38c] ss:$16 sps:$4 sm:$0xff]  }
  0xa4   :  { %1439 = vmatpush1.bf16.msra.mxu1 %v2561_v58  ;;  %v2627_v58 = vld [vmem:[#allocation4 + $0x388] ss:$16 sps:$4 sm:$0xff]  }
  0xa5   :  { %1357 = vmatpush1.bf16.msra.mxu0 %v2558_v57  ;;  %1440 = vmatprep.subr.bf16.mxu1 %v2569_v60  ;;  %v2710_v57 = vld [vmem:[#allocation6 + $0x64] ss:$8 sps:$4 sm:$0xff]  }
  0xa6   :  { %1358 = vmatprep.subr.bf16.mxu0 %v2566_v59  ;;  %v2708_v59 = vld [vmem:[#allocation6 + $0x60] ss:$8 sps:$4 sm:$0xff]   ;;  %v2632_v60 = vld [vmem:[#allocation4 + $0x3ac] ss:$16 sps:$4 sm:$0xff]  }
  0xa8   :  { %1441 = vmatpush1.bf16.msra.mxu1 %v2567_v62  ;;  %v2630_v62 = vld [vmem:[#allocation4 + $0x3a8] ss:$16 sps:$4 sm:$0xff]  }
  0xa9   :  { %1359 = vmatpush1.bf16.msra.mxu0 %v2564_v61  ;;  %1442 = vmatprep.subr.bf16.mxu1 %v2575_v0  ;;  %v2713_v61 = vld [vmem:[#allocation6 + $0x74] ss:$8 sps:$4 sm:$0xff]  }
  0xaa   :  { %1360 = vmatprep.subr.bf16.mxu0 %v2572_v63  ;;  %v2711_v63 = vld [vmem:[#allocation6 + $0x70] ss:$8 sps:$4 sm:$0xff]   ;;  %v2635_v0 = vld [vmem:[#allocation4 + $0x3cc] ss:$16 sps:$4 sm:$0xff]  }
  0xac   :  { %1443 = vmatpush1.bf16.msra.mxu1 %v2573_v2  ;;  %v2633_v2 = vld [vmem:[#allocation4 + $0x3c8] ss:$16 sps:$4 sm:$0xff]  }
  0xad   :  { %1361 = vmatpush1.bf16.msra.mxu0 %v2570_v1  ;;  %1444 = vmatprep.subr.bf16.mxu1 %v2581_v4  ;;  %v2716_v1 = vld [vmem:[#allocation6 + $0x84] ss:$8 sps:$4 sm:$0xff]  }
  0xae   :  { %1362 = vmatprep.subr.bf16.mxu0 %v2578_v3  ;;  %v2714_v3 = vld [vmem:[#allocation6 + $0x80] ss:$8 sps:$4 sm:$0xff]   ;;  %v2638_v4 = vld [vmem:[#allocation4 + $0x3ec] ss:$16 sps:$4 sm:$0xff]  }
  0xb0   :  { %1445 = vmatpush1.bf16.msra.mxu1 %v2579_v6  ;;  %v2636_v6 = vld [vmem:[#allocation4 + $0x3e8] ss:$16 sps:$4 sm:$0xff]  }
  0xb1   :  { %1363 = vmatpush1.bf16.msra.mxu0 %v2576_v5  ;;  %1446 = vmatprep.subr.bf16.mxu1 %v2587_v9  ;;  %v2719_v5 = vld [vmem:[#allocation6 + $0x94] ss:$8 sps:$4 sm:$0xff]  }
  0xb2   :  { %1364 = vmatprep.subr.bf16.mxu0 %v2584_v7  ;;  %v2717_v7 = vld [vmem:[#allocation6 + $0x90] ss:$8 sps:$4 sm:$0xff]   ;;  %v2641_v9 = vld [vmem:[#allocation4 + $0x40c] ss:$16 sps:$4 sm:$0xff]  }
  0xb4   :  { %1447 = vmatpush1.bf16.msra.mxu1 %v2585_v12  ;;  %v2639_v12 = vld [vmem:[#allocation4 + $0x408] ss:$16 sps:$4 sm:$0xff]  }
  0xb5   :  { %1365 = vmatpush1.bf16.msra.mxu0 %v2582_v10  ;;  %1457 = vmatprep.subr.bf16.mxu1 %v2590_v14  ;;  %v2722_v10 = vld [vmem:[#allocation6 + $0xa4] ss:$8 sps:$4 sm:$0xff]   ;;  %v2720_v14 = vld [vmem:[#allocation6 + $0xa0] ss:$8 sps:$4 sm:$0xff]  }
  0xb6   :  { %1375 = vmatprep.subr.bf16.mxu0 %v2596_v15  ;;  %v2725_v15 = vld [vmem:[#allocation6 + $0xb4] ss:$8 sps:$4 sm:$0xff]  }
  0xb7   :  { %1449 = vmatmul.mubr.bf16.vlgmr.msra.gmra.mrb[4].mxu1 %v2935_v8  ;;  %v2603_v8 = vld [vmem:[#allocation4 + $0x288] ss:$16 sps:$4 sm:$0xff]  }
  0xb8   :  { %1367 = vmatmul.mubr.bf16.vlgmr.msra.gmra.mrb[0].mxu0 %v2945_v16  ;;  %1458 = vmatpush1.bf16.msra.mxu1 %v2588_v17  ;;  %v2642_v17 = vld [vmem:[#allocation4 + $0x428] ss:$16 sps:$4 sm:$0xff]  }
  0xb9   :  { %1376 = vmatpush1.bf16.msra.mxu0 %v2594_v18  ;;  %1459 = vmatprep.subr.bf16.mxu1 %v2593_v19  ;;  %v2647_v18 = vld [vmem:[#allocation4 + $0x44c] ss:$16 sps:$4 sm:$0xff]   ;;  %v2723_v19 = vld [vmem:[#allocation6 + $0xb0] ss:$8 sps:$4 sm:$0xff]  }
  0xba   :  { %1407 = vmatprep.mubr.bf16.mxu0 %v2867_v22  ;;  %1489 = vmatprep.mubr.bf16.mxu1 %v2931_v52  ;;  %v2609_v52 = vld [vmem:[#allocation4 + $0x2c8] ss:$16 sps:$4 sm:$0xff]  }
  0xbb   :  { %1980 = vmatprep.subr.bf16.mxu0 %v2692_v34  ;;  %v2663_v34 = vld [vmem:[#allocation4 + $0x508] ss:$16 sps:$4 sm:$0xff]  }
  0xbc   :  { %1460 = vmatpush1.bf16.msra.mxu1 %v2591_v20  ;;  %v2728_v20 = vld [vmem:[#allocation6 + $0xc4] ss:$8 sps:$4 sm:$0xff]  }
  0xbd   :  { %1461 = vmatprep.subr.bf16.mxu1 %v2599_v21  ;;  %v2645_v21 = vld [vmem:[#allocation4 + $0x448] ss:$16 sps:$4 sm:$0xff]  }
  0xc0   :  { %1462 = vmatpush1.bf16.msra.mxu1 %v2597_v23  ;;  %v2650_v23 = vld [vmem:[#allocation4 + $0x46c] ss:$16 sps:$4 sm:$0xff]  }
  0xc1   :  { %1463 = vmatprep.subr.bf16.mxu1 %v2602_v25  ;;  %v2731_v25 = vld [vmem:[#allocation6 + $0xd4] ss:$8 sps:$4 sm:$0xff]  }
  0xc4   :  { %2295 = vmatmul.mubr.msk.bf16.vlgmr.msra.gmra.mrb[0].mxu0 %vm1248_vm0, %v2951_v27  ;;  %1464 = vmatpush1.bf16.msra.mxu1 %v2600_v26  ;;  %v2653_v26 = vld [vmem:[#allocation4 + $0x48c] ss:$16 sps:$4 sm:$0xff]  }
  0xc5   :  { %1465 = vmatprep.subr.bf16.mxu1 %v2605_v28  ;;  %1981 = vmatpush1.bf16.msra.mxu0 %v2690_v33  ;;  %v2651_v28 = vld [vmem:[#allocation4 + $0x488] ss:$16 sps:$4 sm:$0xff]   ;;  %v2665_v33 = vld [vmem:[#allocation4 + $0x50c] ss:$16 sps:$4 sm:$0xff]  }
  0xc6   :  { %1982 = vmatprep.subr.bf16.mxu0 %v2695_v36  ;;  %v2668_v36 = vld [vmem:[#allocation4 + $0x52c] ss:$16 sps:$4 sm:$0xff]  }
  0xc8   :  { %1466 = vmatpush1.bf16.msra.mxu1 %v2603_v8  ;;  %v2656_v8 = vld [vmem:[#allocation4 + $0x4ac] ss:$16 sps:$4 sm:$0xff]  }
  0xc9   :  { %1467 = vmatprep.subr.bf16.mxu1 %v2608_v29  ;;  %1983 = vmatpush1.bf16.msra.mxu0 %v2693_v38  ;;  %v2654_v29 = vld [vmem:[#allocation4 + $0x4a8] ss:$16 sps:$4 sm:$0xff]  }
  0xca   :  { %1984 = vmatprep.subr.bf16.mxu0 %v2698_v40  ;;  %v2732_v38 = vld [vmem:[#allocation6 + $0xe0] ss:$8 sps:$4 sm:$0xff]   ;;  %v2671_v40 = vld [vmem:[#allocation4 + $0x54c] ss:$16 sps:$4 sm:$0xff]  }
  0xcc   :  { %1468 = vmatpush1.bf16.msra.mxu1 %v2606_v30  ;;  %v2659_v30 = vld [vmem:[#allocation4 + $0x4cc] ss:$16 sps:$4 sm:$0xff]  }
  0xcd   :  { %1469 = vmatprep.subr.bf16.mxu1 %v2611_v31  ;;  %1985 = vmatpush1.bf16.msra.mxu0 %v2696_v42  ;;  %v2657_v31 = vld [vmem:[#allocation4 + $0x4c8] ss:$16 sps:$4 sm:$0xff]  }
  0xce   :  { %1986 = vmatprep.subr.bf16.mxu0 %v2701_v44  ;;  %v2735_v42 = vld [vmem:[#allocation6 + $0xf0] ss:$8 sps:$4 sm:$0xff]   ;;  %v2674_v44 = vld [vmem:[#allocation4 + $0x56c] ss:$16 sps:$4 sm:$0xff]  }
  0xd0   :  { %1470 = vmatpush1.bf16.msra.mxu1 %v2609_v52  ;;  %v2662_v52 = vld [vmem:[#allocation4 + $0x4ec] ss:$16 sps:$4 sm:$0xff]  }
  0xd1   :  { %1471 = vmatprep.subr.bf16.mxu1 %v2614_v32  ;;  %1987 = vmatpush1.bf16.msra.mxu0 %v2699_v46  ;;  %v2660_v32 = vld [vmem:[#allocation4 + $0x4e8] ss:$16 sps:$4 sm:$0xff]   ;;  %v2740_v46 = vld [vmem:[#allocation6 + $0x104] ss:$8 sps:$4 sm:$0xff]  }
  0xd2   :  { %1988 = vmatprep.subr.bf16.mxu0 %v2704_v48  ;;  %v2675_v48 = vld [vmem:[#allocation4 + $0x588] ss:$16 sps:$4 sm:$0xff]  }
  0xd4   :  { %1472 = vmatpush1.bf16.msra.mxu1 %v2612_v37  ;;  %v2734_v37 = vld [vmem:[#allocation6 + $0xe4] ss:$8 sps:$4 sm:$0xff]  }
  0xd5   :  { %1473 = vmatprep.subr.bf16.mxu1 %v2617_v39  ;;  %1989 = vmatpush1.bf16.msra.mxu0 %v2702_v50  ;;  %v2666_v39 = vld [vmem:[#allocation4 + $0x528] ss:$16 sps:$4 sm:$0xff]  }
  0xd6   :  { %1990 = vmatprep.subr.bf16.mxu0 %v2707_v53  ;;  %v2678_v50 = vld [vmem:[#allocation4 + $0x5a8] ss:$16 sps:$4 sm:$0xff]  }
  0xd7   :  { %v2681_v53 = vld [vmem:[#allocation4 + $0x5c8] ss:$16 sps:$4 sm:$0xff]  }
  0xd8   :  { %1474 = vmatpush1.bf16.msra.mxu1 %v2615_v41  ;;  %v2737_v41 = vld [vmem:[#allocation6 + $0xf4] ss:$8 sps:$4 sm:$0xff]  }
  0xd9   :  { %1475 = vmatprep.subr.bf16.mxu1 %v2620_v43  ;;  %1991 = vmatpush1.bf16.msra.mxu0 %v2705_v55  ;;  %v2669_v43 = vld [vmem:[#allocation4 + $0x548] ss:$16 sps:$4 sm:$0xff]  }
  0xda   :  { %1992 = vmatprep.subr.bf16.mxu0 %v2710_v57  ;;  %v2684_v55 = vld [vmem:[#allocation4 + $0x5e8] ss:$16 sps:$4 sm:$0xff]  }
  0xdb   :  { %v2687_v57 = vld [vmem:[#allocation4 + $0x608] ss:$16 sps:$4 sm:$0xff]  }
  0xdc   :  { %1476 = vmatpush1.bf16.msra.mxu1 %v2618_v45  ;;  %v2672_v45 = vld [vmem:[#allocation4 + $0x568] ss:$16 sps:$4 sm:$0xff]  }
  0xdd   :  { %1477 = vmatprep.subr.bf16.mxu1 %v2623_v47  ;;  %1993 = vmatpush1.bf16.msra.mxu0 %v2708_v59  ;;  %v2677_v47 = vld [vmem:[#allocation4 + $0x58c] ss:$16 sps:$4 sm:$0xff]  }
  0xde   :  { %1994 = vmatprep.subr.bf16.mxu0 %v2713_v61 }
  0xe0   :  { %1478 = vmatpush1.bf16.msra.mxu1 %v2621_v49  ;;  %v2680_v49 = vld [vmem:[#allocation4 + $0x5ac] ss:$16 sps:$4 sm:$0xff]  }
  0xe1   :  { %1479 = vmatprep.subr.bf16.mxu1 %v2626_v51  ;;  %1995 = vmatpush1.bf16.msra.mxu0 %v2711_v63  ;;  %v2683_v51 = vld [vmem:[#allocation4 + $0x5cc] ss:$16 sps:$4 sm:$0xff]  }
  0xe2   :  { %1996 = vmatprep.subr.bf16.mxu0 %v2716_v1 }
  0xe4   :  { %1480 = vmatpush1.bf16.msra.mxu1 %v2624_v54  ;;  %v2686_v54 = vld [vmem:[#allocation4 + $0x5ec] ss:$16 sps:$4 sm:$0xff]  }
  0xe5   :  { %1481 = vmatprep.subr.bf16.mxu1 %v2629_v56  ;;  %1997 = vmatpush1.bf16.msra.mxu0 %v2714_v3  ;;  %v2689_v56 = vld [vmem:[#allocation4 + $0x60c] ss:$16 sps:$4 sm:$0xff]  }
  0xe6   :  { %1998 = vmatprep.subr.bf16.mxu0 %v2719_v5 }
  0xe8   :  { %1482 = vmatpush1.bf16.msra.mxu1 %v2627_v58 }
  0xe9   :  { %1483 = vmatprep.subr.bf16.mxu1 %v2632_v60  ;;  %1999 = vmatpush1.bf16.msra.mxu0 %v2717_v7 }
  0xea   :  { %2000 = vmatprep.subr.bf16.mxu0 %v2722_v10  ;;  %v2741_v10 = vld [vmem:[#allocation6 + $0x110] ss:$8 sps:$4 sm:$0xff]  }
  0xec   :  { %1484 = vmatpush1.bf16.msra.mxu1 %v2630_v62 }
  0xed   :  { %1485 = vmatprep.subr.bf16.mxu1 %v2635_v0  ;;  %2001 = vmatpush1.bf16.msra.mxu0 %v2720_v14  ;;  %v2749_v14 = vld [vmem:[#allocation6 + $0x134] ss:$8 sps:$4 sm:$0xff]  }
  0xee   :  { %2002 = vmatprep.subr.bf16.mxu0 %v2725_v15  ;;  %v2747_v15 = vld [vmem:[#allocation6 + $0x130] ss:$8 sps:$4 sm:$0xff]  }
  0xf0   :  { %1486 = vmatpush1.bf16.msra.mxu1 %v2633_v2 }
  0xf1   :  { %1487 = vmatprep.subr.bf16.mxu1 %v2638_v4  ;;  %2003 = vmatpush1.bf16.msra.mxu0 %v2723_v19  ;;  %v2755_v19 = vld [vmem:[#allocation6 + $0x154] ss:$8 sps:$4 sm:$0xff]  }
  0xf2   :  { %2004 = vmatprep.subr.bf16.mxu0 %v2728_v20  ;;  %v2753_v20 = vld [vmem:[#allocation6 + $0x150] ss:$8 sps:$4 sm:$0xff]  }
  0xf4   :  { %1488 = vmatpush1.bf16.msra.mxu1 %v2636_v6 }
  0xf5   :  { %1498 = vmatprep.subr.bf16.mxu1 %v2641_v9  ;;  %2005 = vmatpush1.bf16.msra.mxu0 %v2726_v24  ;;  %v2743_v9 = vld [vmem:[#allocation6 + $0x114] ss:$8 sps:$4 sm:$0xff]  }
  0xf6   :  { %2006 = vmatprep.subr.bf16.mxu0 %v2731_v25  ;;  %v2761_v24 = vld [vmem:[#allocation6 + $0x174] ss:$8 sps:$4 sm:$0xff]   ;;  %v2759_v25 = vld [vmem:[#allocation6 + $0x170] ss:$8 sps:$4 sm:$0xff]  }
  0xf7   :  { %1490 = vmatmul.mubr.bf16.vlgmr.msra.gmra.mrb[4].mxu1 %v2937_v11  ;;  %v2648_v11 = vld [vmem:[#allocation4 + $0x468] ss:$16 sps:$4 sm:$0xff]  }
  0xf8   :  { %1499 = vmatpush1.bf16.msra.mxu1 %v2639_v12  ;;  %1530 = vmatprep.mubr.bf16.mxu1 %v2942_v35  ;;  %v2729_v35 = vld [vmem:[#allocation6 + $0xd0] ss:$8 sps:$4 sm:$0xff]   ;;  %v2746_v12 = vld [vmem:[#allocation6 + $0x124] ss:$8 sps:$4 sm:$0xff]  }
  0xf9   :  { %1500 = vmatprep.subr.bf16.mxu1 %v2644_v13  ;;  %2007 = vmatpush1.bf16.msra.mxu0 %v2729_v35  ;;  %v2744_v13 = vld [vmem:[#allocation6 + $0x120] ss:$8 sps:$4 sm:$0xff]   ;;  %v2767_v35 = vld [vmem:[#allocation6 + $0x194] ss:$8 sps:$4 sm:$0xff]  }
  0xfa   :  { %2008 = vmatprep.subr.bf16.mxu0 %v2734_v37  ;;  %v2780_v37 = vld [vmem:[#allocation6 + $0x1e0] ss:$8 sps:$4 sm:$0xff]  }
  0xfc   :  { %1501 = vmatpush1.bf16.msra.mxu1 %v2642_v17  ;;  %v2752_v17 = vld [vmem:[#allocation6 + $0x144] ss:$8 sps:$4 sm:$0xff]  }
  0xfd   :  { %1502 = vmatprep.subr.bf16.mxu1 %v2647_v18  ;;  %2009 = vmatpush1.bf16.msra.mxu0 %v2732_v38  ;;  %v2750_v18 = vld [vmem:[#allocation6 + $0x140] ss:$8 sps:$4 sm:$0xff]   ;;  %v2785_v38 = vld [vmem:[#allocation6 + $0x1f4] ss:$8 sps:$4 sm:$0xff]  }
  0xfe   :  { %2010 = vmatprep.subr.bf16.mxu0 %v2737_v41 }
 0x100   :  { %1503 = vmatpush1.bf16.msra.mxu1 %v2645_v21  ;;  %v2758_v21 = vld [vmem:[#allocation6 + $0x164] ss:$8 sps:$4 sm:$0xff]  }
 0x101   :  { %1504 = vmatprep.subr.bf16.mxu1 %v2650_v23  ;;  %2011 = vmatpush1.bf16.msra.mxu0 %v2735_v42  ;;  %v2756_v23 = vld [vmem:[#allocation6 + $0x160] ss:$8 sps:$4 sm:$0xff]  }
 0x102   :  { %2021 = vmatprep.subr.bf16.mxu0 %v2740_v46 }
 0x104   :  { %1505 = vmatpush1.bf16.msra.mxu1 %v2648_v11  ;;  %v2764_v11 = vld [vmem:[#allocation6 + $0x184] ss:$8 sps:$4 sm:$0xff]  }
 0x105   :  { %1506 = vmatprep.subr.bf16.mxu1 %v2653_v26  ;;  %v2762_v26 = vld [vmem:[#allocation6 + $0x180] ss:$8 sps:$4 sm:$0xff]  }
 0x108   :  { %1507 = vmatpush1.bf16.msra.mxu1 %v2651_v28  ;;  %v2765_v28 = vld [vmem:[#allocation6 + $0x190] ss:$8 sps:$4 sm:$0xff]  }
 0x109   :  { %1508 = vmatprep.subr.bf16.mxu1 %v2656_v8  ;;  %v2770_v8 = vld [vmem:[#allocation6 + $0x1a4] ss:$8 sps:$4 sm:$0xff]  }
 0x10c   :  { %1509 = vmatpush1.bf16.msra.mxu1 %v2654_v29  ;;  %v2768_v29 = vld [vmem:[#allocation6 + $0x1a0] ss:$8 sps:$4 sm:$0xff]  }
 0x10d   :  { %1510 = vmatprep.subr.bf16.mxu1 %v2659_v30  ;;  %v2773_v30 = vld [vmem:[#allocation6 + $0x1b4] ss:$8 sps:$4 sm:$0xff]  }
 0x110   :  { %1511 = vmatpush1.bf16.msra.mxu1 %v2657_v31  ;;  %v2771_v31 = vld [vmem:[#allocation6 + $0x1b0] ss:$8 sps:$4 sm:$0xff]  }
 0x111   :  { %1512 = vmatprep.subr.bf16.mxu1 %v2662_v52  ;;  %v2776_v52 = vld [vmem:[#allocation6 + $0x1c4] ss:$8 sps:$4 sm:$0xff]  }
 0x114   :  { %1513 = vmatpush1.bf16.msra.mxu1 %v2660_v32  ;;  %v2774_v32 = vld [vmem:[#allocation6 + $0x1c0] ss:$8 sps:$4 sm:$0xff]  }
 0x115   :  { %1514 = vmatprep.subr.bf16.mxu1 %v2665_v33  ;;  %v2779_v33 = vld [vmem:[#allocation6 + $0x1d4] ss:$8 sps:$4 sm:$0xff]  }
 0x118   :  { %1515 = vmatpush1.bf16.msra.mxu1 %v2663_v34  ;;  %v2777_v34 = vld [vmem:[#allocation6 + $0x1d0] ss:$8 sps:$4 sm:$0xff]  }
 0x119   :  { %1516 = vmatprep.subr.bf16.mxu1 %v2668_v36  ;;  %v2782_v36 = vld [vmem:[#allocation6 + $0x1e4] ss:$8 sps:$4 sm:$0xff]  }
 0x11c   :  { %1517 = vmatpush1.bf16.msra.mxu1 %v2666_v39  ;;  %v2783_v39 = vld [vmem:[#allocation6 + $0x1f0] ss:$8 sps:$4 sm:$0xff]  }
 0x11d   :  { %1518 = vmatprep.subr.bf16.mxu1 %v2671_v40 }
 0x120   :  { %1519 = vmatpush1.bf16.msra.mxu1 %v2669_v43 }
 0x121   :  { %1520 = vmatprep.subr.bf16.mxu1 %v2674_v44 }
 0x124   :  { %1521 = vmatpush1.bf16.msra.mxu1 %v2672_v45 }
 0x125   :  { %1522 = vmatprep.subr.bf16.mxu1 %v2677_v47 }
 0x128   :  { %1523 = vmatpush1.bf16.msra.mxu1 %v2675_v48 }
 0x129   :  { %1524 = vmatprep.subr.bf16.mxu1 %v2680_v49 }
 0x12c   :  { %1525 = vmatpush1.bf16.msra.mxu1 %v2678_v50  ;;  %v2070_v50 = vlaneseq }
 0x12d   :  { %1526 = vmatprep.subr.bf16.mxu1 %v2683_v51 }
 0x12e   :  { %v2071_v51 = vshrl.u32 %v2070_v50, 7 }
 0x130   :  { %1527 = vmatpush1.bf16.msra.mxu1 %v2681_v53  ;;  %v2072_v53 = vsub.s32 0, %v2071_v51 }
 0x131   :  { %1528 = vmatprep.subr.bf16.mxu1 %v2686_v54  ;;  %v2068_v54 = vld [vmem:[%s2970_s3] sm:$0x3] }
 0x134   :  { %1529 = vmatpush1.bf16.msra.mxu1 %v2684_v55  ;;  %v2076_v55 = vsub.s32 1, %v2071_v51 }
 0x135   :  { %1539 = vmatprep.subr.bf16.mxu1 %v2689_v56 }
 0x137   :  { %1531 = vmatmul.mubr.bf16.vlgmr.msra.gmra.mrb[4].mxu1 %v2945_v16 }
 0x138   :  { %1540 = vmatpush1.bf16.msra.mxu1 %v2687_v57  ;;  %1571 = vmatprep.mubr.bf16.mxu1 %v2867_v22  ;;  %v2738_v22 = vld [vmem:[#allocation6 + $0x100] ss:$8 sps:$4 sm:$0xff]   ;;  %v2073_v57 = vrot.slane %v2068_v54, %v2072_v53 }
 0x143   :  { %2296 = vmatmul.mubr.msk.bf16.vlgmr.msra.gmra.mrb[4].mxu1 %vm1248_vm0, %v2951_v27 }
 0x14a   :  { %v1286_v58 = vpop.f32.mrb[0].mxu1 }
 0x14b   :  { %v1288_v59 = vpop.f32.mrb[1].mxu1 }
 0x14c   :  { %v1290_v60 = vpop.f32.mrb[2].mxu1 }
 0x14d   :  { %v1291_v61 = vpop.f32.mrb[3].mxu1  ;;  %v2077_v60 = vrot.slane %v2068_v54, %v2076_v55 }
 0x197   :  { %v1409_v62 = vpop.f32.mrb[0].mxu0 }
 0x198   :  { %v2362_v63 = vadd.f32 %v1409_v62, %v1286_v58  ;;  %v1411_v0 = vpop.f32.mrb[1].mxu0 }
 0x199   :  { %v2363_v1 = vadd.f32 %v1411_v0, %v1288_v59  ;;  %v1413_v2 = vpop.f32.mrb[2].mxu0 }
 0x19a   :  { %v1580_v3 = vpack.c.bf16 %v2362_v63, %v2362_v63  ;;  %v1414_v4 = vpop.f32.mrb[3].mxu0 }
 0x19b   :  { %v1581_v5 = vpack.c.bf16 %v2363_v1, %v2363_v1 }
 0x19c   :  { %v1588_v6 = vmul.bf16 1045249613, %v1580_v3  ;;  %vm1584_vm1 = vcmp.gt.bf16.partialorder %v1580_v3, 0 }
 0x19d   :  { %v1589_v16 = vmul.bf16 1045249613, %v1581_v5  ;;  %vm1585_vm2 = vcmp.gt.bf16.partialorder %v1581_v5, 0 }
 0x19e   :  { %v1592_v27 = vsel %vm1584_vm1, %v1580_v3, %v1588_v6 }
 0x19f   :  { %v1593_v7 = vsel %vm1585_vm2, %v1581_v5, %v1589_v16 }
 0x1a0   :  { %2012 = vmatprep.mubr.bf16.mxu0 %v1593_v7 }
 0x1a1   :  { %2013 = vmatmul.mubr.bf16.vlgmr.msra.gmra.mrb[4].mxu0 %v1592_v27 }
 0x1a2   :  { %2022 = vmatpush1.bf16.msra.mxu0 %v2738_v22 }
 0x1a3   :  { %2023 = vmatprep.subr.bf16.mxu0 %v2743_v9 }
 0x1a6   :  { %2024 = vmatpush1.bf16.msra.mxu0 %v2741_v10 }
 0x1a7   :  { %2025 = vmatprep.subr.bf16.mxu0 %v2746_v12 }
 0x1aa   :  { %2026 = vmatpush1.bf16.msra.mxu0 %v2744_v13 }
 0x1ab   :  { %2027 = vmatprep.subr.bf16.mxu0 %v2749_v14 }
 0x1ae   :  { %2028 = vmatpush1.bf16.msra.mxu0 %v2747_v15 }
 0x1af   :  { %2029 = vmatprep.subr.bf16.mxu0 %v2752_v17 }
 0x1b2   :  { %2030 = vmatpush1.bf16.msra.mxu0 %v2750_v18 }
 0x1b3   :  { %2031 = vmatprep.subr.bf16.mxu0 %v2755_v19 }
 0x1b6   :  { %2032 = vmatpush1.bf16.msra.mxu0 %v2753_v20 }
 0x1b7   :  { %2033 = vmatprep.subr.bf16.mxu0 %v2758_v21 }
 0x1ba   :  { %2034 = vmatpush1.bf16.msra.mxu0 %v2756_v23 }
 0x1bb   :  { %2035 = vmatprep.subr.bf16.mxu0 %v2761_v24 }
 0x1be   :  { %2036 = vmatpush1.bf16.msra.mxu0 %v2759_v25 }
 0x1bf   :  { %2037 = vmatprep.subr.bf16.mxu0 %v2764_v11 }
 0x1c2   :  { %2038 = vmatpush1.bf16.msra.mxu0 %v2762_v26 }
 0x1c3   :  { %2039 = vmatprep.subr.bf16.mxu0 %v2767_v35 }
 0x1c6   :  { %2040 = vmatpush1.bf16.msra.mxu0 %v2765_v28 }
 0x1c7   :  { %2041 = vmatprep.subr.bf16.mxu0 %v2770_v8 }
 0x1ca   :  { %2042 = vmatpush1.bf16.msra.mxu0 %v2768_v29 }
 0x1cb   :  { %2043 = vmatprep.subr.bf16.mxu0 %v2773_v30 }
 0x1ce   :  { %2044 = vmatpush1.bf16.msra.mxu0 %v2771_v31 }
 0x1cf   :  { %2045 = vmatprep.subr.bf16.mxu0 %v2776_v52 }
 0x1d2   :  { %2046 = vmatpush1.bf16.msra.mxu0 %v2774_v32 }
 0x1d3   :  { %2047 = vmatprep.subr.bf16.mxu0 %v2779_v33 }
 0x1d6   :  { %2048 = vmatpush1.bf16.msra.mxu0 %v2777_v34 }
 0x1d7   :  { %2049 = vmatprep.subr.bf16.mxu0 %v2782_v36 }
 0x1da   :  { %2050 = vmatpush1.bf16.msra.mxu0 %v2780_v37 }
 0x1db   :  { %2051 = vmatprep.subr.bf16.mxu0 %v2785_v38 }
 0x1de   :  { %2052 = vmatpush1.bf16.msra.mxu0 %v2783_v39 }
 0x216   :  { %v1573_v40 = vpop.f32.mrb[4].mxu1 }
 0x217   :  { %v1582_v41 = vpack.c.bf16 %v1573_v40, %v1573_v40  ;;  %v1575_v42 = vpop.f32.mrb[5].mxu1 }
 0x218   :  { %v1583_v43 = vpack.c.bf16 %v1575_v42, %v1575_v42  ;;  %v1577_v44 = vpop.f32.mrb[6].mxu1 }
 0x219   :  { %v1590_v45 = vmul.bf16 1045249613, %v1582_v41  ;;  %v1578_v46 = vpop.f32.mrb[7].mxu1  ;;  %vm1586_vm3 = vcmp.gt.bf16.partialorder %v1582_v41, 0 }
 0x21a   :  { %v1591_v47 = vmul.bf16 1045249613, %v1583_v43  ;;  %vm1587_vm4 = vcmp.gt.bf16.partialorder %v1583_v43, 0 }
 0x21b   :  { %v1594_v49 = vsel %vm1586_vm3, %v1582_v41, %v1590_v45 }
 0x21c   :  { %v1595_v48 = vsel %vm1587_vm4, %v1583_v43, %v1591_v47 }
 0x21d   :  { %2053 = vmatprep.mubr.bf16.mxu0 %v1595_v48 }
 0x21e   :  { %2054 = vmatmul.mubr.bf16.vlgmr.msra.gmra.mrb[4].mxu0 %v1594_v49 }
 0x2f1   :  { %v2055_v56 = vpop.f32.mrb[4].mxu0 }
 0x2f2   :  { %vm2062_vm5 = vcmp.gt.f32.partialorder %v2055_v56, 0.0  ;;  %v2064_v58 = vmul.f32 0.2, %v2055_v56  ;;  %v2057_v59 = vpop.f32.mrb[5].mxu0 }
 0x2f3   :  { %vm2063_vm6 = vcmp.gt.f32.partialorder %v2057_v59, 0.0  ;;  %v2065_v61 = vmul.f32 0.2, %v2057_v59  ;;  %v2059_v62 = vpop.f32.mrb[6].mxu0 }
 0x2f4   :  { %v2060_v63 = vpop.f32.mrb[7].mxu0  ;;  %v2066_v0 = vsel %vm2062_vm5, %v2055_v56, %v2064_v58 }
 0x2f5   :  { %v2067_v1 = vsel %vm2063_vm6, %v2057_v59, %v2065_v61  ;;  %v2080_v2 = vmul.f32 %v2073_v57, %v2066_v0 }
 0x2f6   :  { %v2081_v3 = vmul.f32 %v2077_v60, %v2067_v1 }
 0x2f8   :  { %v2082_v4 = vadd.f32 %v2081_v3, %v2080_v2 }
 0x2fa   :  { %2083 = vadd.xlane.f32.xlu0 %v2082_v4 }
 0x387   :  { %v2084_v5 = vpop.xlane.xlu0 %2083 }
 0x388   :  { %v2361_v6 = vmul.f32 -1.442695, %v2084_v5 }
 0x38a   :  { %2786 = vpow2.f32 %v2361_v6 }
 0x394   :  { %v2787_v16 = vpop.eup %2786 }
 0x395   :  { %v2088_v22 = vadd.f32 1.0, %v2787_v16 }
 0x397   :  { %2788 = vrcp.f32 %v2088_v22 }
 0x3a1   :  { %v2789_v7 = vpop.eup %2788 }
 0x3a2   :  { %2092 = vst.msk [vmem:[%s2971_s4] sm:$0xff] %vm2091_vm7, %v2789_v7 }
 0x3a3   :  { %2097 = vsyncpa [#allocation3], 1 }
 0x3a4   :  { %2098 = vsyncpa [#allocation5], 1 }

</bundles_post_ra>
